<compile_context>
chip_gen: v7x
topology: tpu7x:2x2x1
jax: 0.10.0
libtpu: 0.0.40
codegen_flags: <defaults>
</compile_context>

<pallas_src>
import functools

import jax
import jax.numpy as jnp
from jax import lax
from jax.experimental import pallas as pl
from jax.experimental.pallas import tpu as pltpu


def _blur_kernel(g1_ref, x_ref, o_ref, xsp_ref, *, C, OC, K, H, W):
    """One batch element per grid step.

    g1_ref  : SMEM (K,) f32 -- 1-D separable Gaussian taps (symmetric).
    x_ref   : VMEM (1, C, H, W) input block (unpadded).
    o_ref   : VMEM (1, OC, H, W) output block.
    xsp_ref : VMEM (H + 2*pad, WL) scratch, WL a multiple of 128.
    """
    pad = K // 2
    WL = xsp_ref.shape[1]

    # --- channel collapse: all (oc, ic) filters are identical ---------------
    xs = x_ref[0, 0, :, :]
    for ic in range(1, C):
        xs = xs + x_ref[0, ic, :, :]

    # --- stage into a zero-padded, lane-dense scratch ------------------------
    # Rows [0, pad) and [pad+H, Hp) and columns [W, WL) stay zero: they act as
    # the conv halo.  Re-zeroed every step so the kernel stays correct when the
    # "parallel" batch axis is sharded across TensorCores (per-core scratch).
    xsp_ref[...] = jnp.zeros_like(xsp_ref)
    xsp_ref[pad:pad + H, 0:W] = xs

    # --- hoisted scalar taps (Gaussian is symmetric: pad+1 distinct values) --
    t = [g1_ref[pad + j] for j in range(pad + 1)]

    # --- separable vertical pass (sublane-offset slices) -> (H, WL) ----------
    tmp = t[0] * xsp_ref[pad:pad + H, :]
    for j in range(1, pad + 1):
        tmp = tmp + t[j] * (xsp_ref[pad + j:pad + j + H, :] +
                            xsp_ref[pad - j:pad - j + H, :])

    # --- separable horizontal pass via XLU lane rotations --------------------
    # Columns >= W of `tmp` are exactly zero, so the circular wrap of the
    # rotation supplies the zero padding on both edges.
    acc = t[0] * tmp
    for j in range(1, pad + 1):
        acc = acc + t[j] * (pltpu.roll(tmp, shift=j, axis=1) +
                            pltpu.roll(tmp, shift=WL - j, axis=1))

    out = acc[:, 0:W]                                     # (H, W)
    # Identical blurred image for every out_channel (weights are identical).
    o_ref[0, :, :, :] = jnp.broadcast_to(out[None, :, :], (OC, H, W))


def _gaussian_1d(kernel_size, sigma):
    """1-D separable factor of the module's normalized Gaussian."""
    K = kernel_size
    r = jnp.arange(-(K // 2), (K + 1) // 2, dtype=jnp.float32)
    e = jnp.exp(-(r ** 2) / (2.0 * sigma ** 2))
    return (e / jnp.sum(e)).astype(jnp.float32)


def _gaussian_2d(kernel_size, sigma):
    """Matches GaussianKernel._create_gaussian_kernel (f32, normalized)."""
    K = kernel_size
    r = jnp.arange(-(K // 2), (K + 1) // 2, dtype=jnp.float32)
    xx, yy = jnp.meshgrid(r, r, indexing="ij")   # torch.meshgrid default 'ij'
    g = (1.0 / (2.0 * jnp.pi * sigma ** 2)) * jnp.exp(
        -(xx ** 2 + yy ** 2) / (2.0 * sigma ** 2))
    return (g / jnp.sum(g)).astype(jnp.float32)


def gaussian_kernel_forward(x, *, sigma, out_channels, kernel_size):
    """Equivalent of GaussianKernel.forward(x) for NCHW float32 input.

    Returns (blurred, weight); `weight` is the OIHW filter the torch module
    builds (used only for the reference check).
    """
    B, C, H, W = x.shape
    K = kernel_size
    # Even K would change the output shape under padding=K//2 (module default is 9).
    assert K % 2 == 1, "only odd kernel_size keeps the (H, W) output shape"
    pad = K // 2
    Hp = H + 2 * pad
    WL = pl.cdiv(W + 2 * pad, 128) * 128          # lane-dense scratch width

    g1 = _gaussian_1d(K, sigma)                   # separable taps used in-kernel
    g2 = _gaussian_2d(K, sigma)                   # full 2-D kernel (module parity)
    weight = jnp.tile(g2[None, None, :, :], (out_channels, C, 1, 1))

    kernel = functools.partial(_blur_kernel, C=C, OC=out_channels, K=K, H=H, W=W)
    out = pl.pallas_call(
        kernel,
        out_shape=jax.ShapeDtypeStruct((B, out_channels, H, W), jnp.float32),
        grid=(B,),
        in_specs=[
            # K separable taps in SMEM (handful of scalar reads, hoisted).
            pl.BlockSpec(memory_space=pltpu.MemorySpace.SMEM),
            # One batch element, all input channels, unpadded (halo built in VMEM).
            pl.BlockSpec((1, C, H, W), lambda b: (b, 0, 0, 0)),
        ],
        # One fat (1, OC, H, W) output block per grid step (oc axis collapsed).
        out_specs=pl.BlockSpec((1, out_channels, H, W), lambda b: (b, 0, 0, 0)),
        scratch_shapes=[pltpu.VMEM((Hp, WL), jnp.float32)],
        # Batch axis is embarrassingly parallel -> shards across the 2
        # TensorCores on v7x; no-op on v5e/v6e.
        compiler_params=pltpu.CompilerParams(dimension_semantics=("parallel",)),
        # NOTE: for large images, tile W in 128-lane chunks and H in strips
        # (+pad halo) so blocks stay within v7x's smaller VMEM.
    )(g1, x)
    return out, weight


if __name__ == "__main__":
    B, C, H, W = 2, 4, 16, 16
    out_channels = 4
    kernel_size = 9
    sigma = jnp.float32(3.0)          # nn.Parameter([3.0]) in the module

    key = jax.random.PRNGKey(0)
    x = jax.random.normal(key, (B, C, H, W), dtype=jnp.float32)

    out, weight = gaussian_kernel_forward(
        x, sigma=sigma, out_channels=out_channels, kernel_size=kernel_size)
    out = jax.block_until_ready(out)

    pad = kernel_size // 2
    ref = lax.conv_general_dilated(
        x, weight, window_strides=(1, 1),
        padding=((pad, pad), (pad, pad)),
        dimension_numbers=("NCHW", "OIHW", "NCHW"))

    assert out.shape == (B, out_channels, H, W)
    assert jnp.allclose(out, ref, atol=1e-4, rtol=1e-4), "mismatch vs reference conv"
    print("KERNEL_OK")
</pallas_src>

<mosaic_0001>
module attributes {stable_mosaic.version = 11 : i64} {
  func.func @_blur_kernel(%arg0: i32, %arg1: memref<9xf32, #tpu.memory_space<smem>>, %arg2: memref<1x4x16x16xf32, #tpu.memory_space<vmem>>, %arg3: memref<1x4x16x16xf32, #tpu.memory_space<vmem>>, %arg4: memref<24x128xf32, #tpu.memory_space<vmem>>) attributes {dimension_semantics = [#tpu.dimension_semantics<parallel>], iteration_bounds = array<i64: 2>, scalar_prefetch = 0 : i64, scratch_operands = 1 : i64, tpu.core_type = #tpu.core_type<tc>, window_params = [{transform_indices = @transform_0, window_bounds = array<i64: 9>}, {transform_indices = @transform_1, window_bounds = array<i64: 1, 4, 16, 16>}, {transform_indices = @transform_2, window_bounds = array<i64: 1, 4, 16, 16>}]} {
    %c0 = arith.constant 0 : index
    %c0_0 = arith.constant 0 : index
    %c0_1 = arith.constant 0 : index
    %c0_2 = arith.constant 0 : index
    %0 = vector.load %arg2[%c0, %c0_0, %c0_1, %c0_2] : memref<1x4x16x16xf32, #tpu.memory_space<vmem>>, vector<1x1x16x16xf32>
    %1 = vector.shape_cast %0 : vector<1x1x16x16xf32> to vector<16x16xf32>
    %c0_3 = arith.constant 0 : index
    %c1 = arith.constant 1 : index
    %c0_4 = arith.constant 0 : index
    %c0_5 = arith.constant 0 : index
    %2 = vector.load %arg2[%c0_3, %c1, %c0_4, %c0_5] : memref<1x4x16x16xf32, #tpu.memory_space<vmem>>, vector<1x1x16x16xf32>
    %3 = vector.shape_cast %2 : vector<1x1x16x16xf32> to vector<16x16xf32>
    %4 = arith.addf %1, %3 : vector<16x16xf32>
    %c0_6 = arith.constant 0 : index
    %c2 = arith.constant 2 : index
    %c0_7 = arith.constant 0 : index
    %c0_8 = arith.constant 0 : index
    %5 = vector.load %arg2[%c0_6, %c2, %c0_7, %c0_8] : memref<1x4x16x16xf32, #tpu.memory_space<vmem>>, vector<1x1x16x16xf32>
    %6 = vector.shape_cast %5 : vector<1x1x16x16xf32> to vector<16x16xf32>
    %7 = arith.addf %4, %6 : vector<16x16xf32>
    %c0_9 = arith.constant 0 : index
    %c3 = arith.constant 3 : index
    %c0_10 = arith.constant 0 : index
    %c0_11 = arith.constant 0 : index
    %8 = vector.load %arg2[%c0_9, %c3, %c0_10, %c0_11] : memref<1x4x16x16xf32, #tpu.memory_space<vmem>>, vector<1x1x16x16xf32>
    %9 = vector.shape_cast %8 : vector<1x1x16x16xf32> to vector<16x16xf32>
    %10 = arith.addf %7, %9 : vector<16x16xf32>
    %cst = arith.constant 0.000000e+00 : f32
    %11 = vector.broadcast %cst : f32 to vector<24x128xf32>
    %c0_12 = arith.constant 0 : index
    %c0_13 = arith.constant 0 : index
    %12 = vector.load %arg4[%c0_12, %c0_13] : memref<24x128xf32, #tpu.memory_space<vmem>>, vector<24x128xf32>
    tpu.vector_store %arg4[%c0_12, %c0_13], %11 {strides = array<i32>} : memref<24x128xf32, #tpu.memory_space<vmem>>, vector<24x128xf32>,
    %c4 = arith.constant 4 : index
    %c0_14 = arith.constant 0 : index
    %13 = vector.load %arg4[%c4, %c0_14] : memref<24x128xf32, #tpu.memory_space<vmem>>, vector<16x16xf32>
    tpu.vector_store %arg4[%c4, %c0_14], %10 {strides = array<i32>} : memref<24x128xf32, #tpu.memory_space<vmem>>, vector<16x16xf32>,
    %c4_15 = arith.constant 4 : index
    %14 = memref.load %arg1[%c4_15] : memref<9xf32, #tpu.memory_space<smem>>
    %c5 = arith.constant 5 : index
    %15 = memref.load %arg1[%c5] : memref<9xf32, #tpu.memory_space<smem>>
    %c6 = arith.constant 6 : index
    %16 = memref.load %arg1[%c6] : memref<9xf32, #tpu.memory_space<smem>>
    %c7 = arith.constant 7 : index
    %17 = memref.load %arg1[%c7] : memref<9xf32, #tpu.memory_space<smem>>
    %c8 = arith.constant 8 : index
    %18 = memref.load %arg1[%c8] : memref<9xf32, #tpu.memory_space<smem>>
    %c4_16 = arith.constant 4 : index
    %c0_17 = arith.constant 0 : index
    %19 = vector.load %arg4[%c4_16, %c0_17] : memref<24x128xf32, #tpu.memory_space<vmem>>, vector<16x128xf32>
    %20 = vector.broadcast %14 : f32 to vector<16x128xf32>
    %21 = arith.mulf %20, %19 : vector<16x128xf32>
    %c5_18 = arith.constant 5 : index
    %c0_19 = arith.constant 0 : index
    %22 = vector.load %arg4[%c5_18, %c0_19] : memref<24x128xf32, #tpu.memory_space<vmem>>, vector<16x128xf32>
    %c3_20 = arith.constant 3 : index
    %c0_21 = arith.constant 0 : index
    %23 = vector.load %arg4[%c3_20, %c0_21] : memref<24x128xf32, #tpu.memory_space<vmem>>, vector<16x128xf32>
    %24 = arith.addf %22, %23 : vector<16x128xf32>
    %25 = vector.broadcast %15 : f32 to vector<16x128xf32>
    %26 = arith.mulf %25, %24 : vector<16x128xf32>
    %27 = arith.addf %21, %26 : vector<16x128xf32>
    %c6_22 = arith.constant 6 : index
    %c0_23 = arith.constant 0 : index
    %28 = vector.load %arg4[%c6_22, %c0_23] : memref<24x128xf32, #tpu.memory_space<vmem>>, vector<16x128xf32>
    %c2_24 = arith.constant 2 : index
    %c0_25 = arith.constant 0 : index
    %29 = vector.load %arg4[%c2_24, %c0_25] : memref<24x128xf32, #tpu.memory_space<vmem>>, vector<16x128xf32>
    %30 = arith.addf %28, %29 : vector<16x128xf32>
    %31 = vector.broadcast %16 : f32 to vector<16x128xf32>
    %32 = arith.mulf %31, %30 : vector<16x128xf32>
    %33 = arith.addf %27, %32 : vector<16x128xf32>
    %c7_26 = arith.constant 7 : index
    %c0_27 = arith.constant 0 : index
    %34 = vector.load %arg4[%c7_26, %c0_27] : memref<24x128xf32, #tpu.memory_space<vmem>>, vector<16x128xf32>
    %c1_28 = arith.constant 1 : index
    %c0_29 = arith.constant 0 : index
    %35 = vector.load %arg4[%c1_28, %c0_29] : memref<24x128xf32, #tpu.memory_space<vmem>>, vector<16x128xf32>
    %36 = arith.addf %34, %35 : vector<16x128xf32>
    %37 = vector.broadcast %17 : f32 to vector<16x128xf32>
    %38 = arith.mulf %37, %36 : vector<16x128xf32>
    %39 = arith.addf %33, %38 : vector<16x128xf32>
    %c8_30 = arith.constant 8 : index
    %c0_31 = arith.constant 0 : index
    %40 = vector.load %arg4[%c8_30, %c0_31] : memref<24x128xf32, #tpu.memory_space<vmem>>, vector<16x128xf32>
    %c0_32 = arith.constant 0 : index
    %c0_33 = arith.constant 0 : index
    %41 = vector.load %arg4[%c0_32, %c0_33] : memref<24x128xf32, #tpu.memory_space<vmem>>, vector<16x128xf32>
    %42 = arith.addf %40, %41 : vector<16x128xf32>
    %43 = vector.broadcast %18 : f32 to vector<16x128xf32>
    %44 = arith.mulf %43, %42 : vector<16x128xf32>
    %45 = arith.addf %39, %44 : vector<16x128xf32>
    %46 = vector.broadcast %14 : f32 to vector<16x128xf32>
    %47 = arith.mulf %46, %45 : vector<16x128xf32>
    %c1_i32 = arith.constant 1 : i32
    %48 = tpu.dynamic_rotate %45 by %c1_i32 dim 1 : vector<16x128xf32>, i32 -> vector<16x128xf32>
    %c127_i32 = arith.constant 127 : i32
    %49 = tpu.dynamic_rotate %45 by %c127_i32 dim 1 : vector<16x128xf32>, i32 -> vector<16x128xf32>
    %50 = arith.addf %48, %49 : vector<16x128xf32>
    %51 = vector.broadcast %15 : f32 to vector<16x128xf32>
    %52 = arith.mulf %51, %50 : vector<16x128xf32>
    %53 = arith.addf %47, %52 : vector<16x128xf32>
    %c2_i32 = arith.constant 2 : i32
    %54 = tpu.dynamic_rotate %45 by %c2_i32 dim 1 : vector<16x128xf32>, i32 -> vector<16x128xf32>
    %c126_i32 = arith.constant 126 : i32
    %55 = tpu.dynamic_rotate %45 by %c126_i32 dim 1 : vector<16x128xf32>, i32 -> vector<16x128xf32>
    %56 = arith.addf %54, %55 : vector<16x128xf32>
    %57 = vector.broadcast %16 : f32 to vector<16x128xf32>
    %58 = arith.mulf %57, %56 : vector<16x128xf32>
    %59 = arith.addf %53, %58 : vector<16x128xf32>
    %c3_i32 = arith.constant 3 : i32
    %60 = tpu.dynamic_rotate %45 by %c3_i32 dim 1 : vector<16x128xf32>, i32 -> vector<16x128xf32>
    %c125_i32 = arith.constant 125 : i32
    %61 = tpu.dynamic_rotate %45 by %c125_i32 dim 1 : vector<16x128xf32>, i32 -> vector<16x128xf32>
    %62 = arith.addf %60, %61 : vector<16x128xf32>
    %63 = vector.broadcast %17 : f32 to vector<16x128xf32>
    %64 = arith.mulf %63, %62 : vector<16x128xf32>
    %65 = arith.addf %59, %64 : vector<16x128xf32>
    %c4_i32 = arith.constant 4 : i32
    %66 = tpu.dynamic_rotate %45 by %c4_i32 dim 1 : vector<16x128xf32>, i32 -> vector<16x128xf32>
    %c124_i32 = arith.constant 124 : i32
    %67 = tpu.dynamic_rotate %45 by %c124_i32 dim 1 : vector<16x128xf32>, i32 -> vector<16x128xf32>
    %68 = arith.addf %66, %67 : vector<16x128xf32>
    %69 = vector.broadcast %18 : f32 to vector<16x128xf32>
    %70 = arith.mulf %69, %68 : vector<16x128xf32>
    %71 = arith.addf %65, %70 : vector<16x128xf32>
    %72 = vector.extract_strided_slice %71 {offsets = [0, 0], sizes = [16, 16], strides = [1, 1]} : vector<16x128xf32> to vector<16x16xf32>
    %73 = vector.shape_cast %72 : vector<16x16xf32> to vector<1x16x16xf32>
    %74 = vector.shape_cast %73 : vector<1x16x16xf32> to vector<1x16x16xf32>
    %75 = vector.broadcast %74 : vector<1x16x16xf32> to vector<4x16x16xf32>
    %c0_34 = arith.constant 0 : index
    %c0_35 = arith.constant 0 : index
    %c0_36 = arith.constant 0 : index
    %c0_37 = arith.constant 0 : index
    %76 = vector.load %arg3[%c0_34, %c0_35, %c0_36, %c0_37] : memref<1x4x16x16xf32, #tpu.memory_space<vmem>>, vector<1x4x16x16xf32>
    %77 = vector.shape_cast %76 : vector<1x4x16x16xf32> to vector<4x16x16xf32>
    %78 = vector.shape_cast %75 : vector<4x16x16xf32> to vector<1x4x16x16xf32>
    tpu.vector_store %arg3[%c0_34, %c0_35, %c0_36, %c0_37], %78 {strides = array<i32>} : memref<1x4x16x16xf32, #tpu.memory_space<vmem>>, vector<1x4x16x16xf32>,
    return
  }
  func.func @transform_0(%arg0: i32) -> i32 {
    %c0_i32 = arith.constant 0 : i32
    %c0_i32_0 = arith.constant 0 : i32
    return %c0_i32 : i32
  }
  func.func @transform_1(%arg0: i32) -> (i32, i32, i32, i32) {
    %c0_i32 = arith.constant 0 : i32
    %c0_i32_0 = arith.constant 0 : i32
    %c0_i32_1 = arith.constant 0 : i32
    %c0_i32_2 = arith.constant 0 : i32
    return %arg0, %c0_i32, %c0_i32_0, %c0_i32_1 : i32, i32, i32, i32
  }
  func.func @transform_2(%arg0: i32) -> (i32, i32, i32, i32) {
    %c0_i32 = arith.constant 0 : i32
    %c0_i32_0 = arith.constant 0 : i32
    %c0_i32_1 = arith.constant 0 : i32
    %c0_i32_2 = arith.constant 0 : i32
    return %arg0, %c0_i32, %c0_i32_0, %c0_i32_1 : i32, i32, i32, i32
  }
}

</mosaic_0001>

<bundles_post_ra>
// kernel: tpu_custom_call.1
= control target key start
LH: loop header
LB: loop body
LE: loop exit
PB: predicated region body
PF: predicated region fallthrough
CT: control target
= control target key end

     0   :  { %7 = vsyncpa [#allocation6], 0  ;;  %s889_s0 = inlined_call_operand.hbm [shape: f32[9], index: 0, kind: input, shape index: {}]   ;;  %s890_s1 = inlined_call_operand.hbm [shape: f32[2,4,16,16], index: 1, kind: input, shape index: {}]   ;;  %s891_s2 = inlined_call_operand.hbm [shape: f32[2,4,16,16], index: 2, kind: output, shape index: {}]  }
   0x1   :  { %8 = vsyncpa [#allocation4], 0 }
   0x2   :  { %10 = vsyncpa [#allocation4 + $0x1], 0 }
   0x3   :  { %11 = vsyncpa [#allocation5], 0 }
   0x4   :  { %13 = vsyncpa [#allocation5 + $0x1], 0  ;;  %s661_s9 = smov 0   ;;  %s663_s10 = smov 0  }
   0x5   :  { %s665_s11 = smov 0   ;;  %s667_s12 = smov 0  }
   0x6 LB: > { %s682_s13 = sadd.s32 4294967295, %s628_s12   ;;  %s416_s14 = sadd.s32 4294967294, %s628_s12   ;;  %s628_s12 = sphi %s667_s12, %s911_s12   ;;  %s624_s11 = sphi %s665_s11, %s910_s11   ;;  %s620_s10 = sphi %s663_s10, %s909_s10   ;;  %s616_s9 = sphi %s661_s9, %s908_s9  }
   0x7   : > { %s686_s15 = sadd.s32 1, %s628_s12   ;;  %s47_s16 = sadd.s32 1, %s624_s11 }
   0x8   : > { %s44_s17 = ssub.s32 %s628_s12, %s686_s15  ;;  %p54_p0 = scmp.ne.s32.totalorder %s624_s11, %s620_s10 }
   0x9   : > { %p45_p1 = scmp.eq.s32.totalorder %s44_s17, 0  ;;  %p55_p2 = scmp.eq.s32.totalorder %s628_s12, 0 }
   0xa   : > { %p60_p3 = scmp.ne.s32.totalorder %s620_s10, %s616_s9  ;;  %p892_p4 = scmp.eq.s32.totalorder %s682_s13, 0 }
   0xb   : > { %s698_s18 = scalar_select %p45_p1, %s624_s11, %s47_s16  }
   0xc   : > { %p700_p5 = por %p55_p2, %p54_p0  ;;  %p706_p6 = por %p892_p4, %p60_p3 }
   0xd   : > { %p84_p7 = scmp.eq.s32.totalorder %s682_s13, 1  ;;  %p90_p8 = scmp.eq.s32.totalorder %s416_s14, 1 }
   0xe   : > { %s896_s20 = scalar_select %p706_p6, 1, 0 }
   0xf   : > { %p417_p9 = scmp.ge.s32.totalorder %s628_s12, 1  ;;  %p97_p10 = scmp.lt.s32.totalorder %s628_s12, 3 }
  0x10   : > { %p713_p11 = por %p84_p7, %p54_p0  ;;  %p717_p12 = por %p90_p8, %p60_p3 }
  0x11   : > { %p721_p13 = pnand %p417_p9, %p97_p10  ;;  %p466_p4 = scmp.lt.s32.totalorder %s628_s12, 2 }
  0x12   : > { %s897_s21 = scalar_select %p713_p11, 1, 0 }
  0x13   : > { %s898_s22 = scalar_select %p717_p12, 1, 0 }
  0x14   : > { %p453_p2 = pneg %p721_p13  ;;  %s119_s24 = sand.u32 1, %s624_s11  }
  0x15   : > { %s443_s25 = sshll.u32 %s628_s12, 10  ;;  %p900_p6 = scmp.eq.s32.totalorder %s682_s13, 0 }
  0x16   : > { %p735_p7 = pnand %p466_p4, %p700_p5  ;;  %s420_s27 = sshll.u32 %s119_s24, 6 }
  0x17   : > { %p454_p0 = pnand %p453_p2, %p900_p6  ;;  %s515_s30 = scalar_lea.hbm %s889_s0, 16 }
  0x18   : > { %p516_p3 = scmp.ne.s32.totalorder %s889_s0, %s515_s30  ;;  %p522_p6 = scmp.lt.u32.totalorder %s515_s30, %s889_s0 }
  0x19   : > { %p517_p8 = pneg %p454_p0 }
  0x1b   : > { %p518_p9 = pnand %p517_p8, %p516_p3 }
  0x1d   : > { %p519_p10 = pneg %p518_p9 }
  0x1f   : > { %p524_p4 = pnand %p522_p6, %p519_p10 }
  0x21   : > { %527 = shalt.err (!%p524_p4)
}
  0x22   : > { %s630_s7 = smov [#allocation3]   ;;  %s754_s19 = scalar_lea.hbm %s890_s1, %s443_s25 }
  0x23   : > { %456 = dma.hbm_to_smem (!%p454_p0), %s889_s0, 16, %s630_s7, [#allocation6]  }
  0x24   : > { %s123_s28 = scalar_lea.vmem [#allocation7], %s420_s27  ;;  %s758_s30 = scalar_lea.sflag [#allocation4], %s119_s24 }
  0x25   : > { %s130_s29 = sshll.u32 %s123_s28, 4  ;;  %s528_s3 = scalar_lea.hbm %s754_s19, 1024  ;;  %s756_s29 = int_to_ptr.vmem [resolvable:$true] %s130_s29 }
  0x26   : > { %p529_p5 = scmp.ne.s32.totalorder %s754_s19, %s528_s3  ;;  %p530_p2 = pneg %p735_p7 }
  0x27   : > { %s533_s5 = scalar_lea.hbm %s890_s1, 2048  ;;  %p534_p8 = scmp.lt.u32.totalorder %s754_s19, %s890_s1 }
  0x28   : > { %p531_p0 = pnand %p530_p2, %p529_p5  ;;  %p535_p9 = scmp.lt.u32.totalorder %s533_s5, %s528_s3 }
  0x29   : > { %p537_p6 = scmp.lt.u32.totalorder %s528_s3, %s754_s19 }
  0x2a   : > { %p532_p3 = pneg %p531_p0  ;;  %p536_p10 = por %p535_p9, %p534_p8 }
  0x2c   : > { %p538_p4 = por %p537_p6, %p536_p10 }
  0x2e   : > { %p539_p1 = pnand %p538_p4, %p532_p3 }
  0x30   : > { %542 = shalt.err (!%p539_p1)
}
  0x31   : > { %s543_s24 = scalar_lea.vmem %s756_s29, 1024  ;;  %s631_s27 = smov [#allocation7]  }
  0x32   : > { %p544_p5 = scmp.ne.s32.totalorder %s756_s29, %s543_s24  ;;  %s548_s8 = sshll.u32 %s631_s27, 4  ;;  %s549_s8 = int_to_ptr.vmem [resolvable:$false] %s548_s8 }
  0x33   : > { %s550_s14 = scalar_lea.vmem %s549_s8, 2048  ;;  %p551_p11 = scmp.lt.s32.totalorder %s756_s29, %s549_s8 }
  0x34   : > { %p546_p0 = pnand %p544_p5, %p530_p2  ;;  %p552_p8 = scmp.lt.s32.totalorder %s550_s14, %s543_s24 }
  0x36   : > { %p547_p12 = pneg %p546_p0  ;;  %p553_p9 = por %p552_p8, %p551_p11 }
  0x38   : > { %p554_p10 = pnand %p553_p9, %p547_p12 }
  0x3a   : > { %557 = shalt.err (!%p554_p10)
}
  0x3b   : > { %s632_s16 = smov 128   ;;  %s633_s17 = smov 8  }
  0x3c   : > { %460 = dma.hbm_to_vmem [thread:$0]  (!%p735_p7), %s754_s19, 1024, %s756_s29, %s758_s30, %s632_s16, %s632_s16, %s633_s17  }
  0x3d   : > { %142 = sbr.rel (%p721_p13) target bundleno = 272 (0x110), region = 28  ;;  %p902_p1 = scmp.eq.s32.totalorder (!%p721_p13), %s682_s13, 0 }
  0x44   : > { %603 = dma.done.wait (%p902_p1), [#allocation6], 16   ;;  %p903_p2 = pmov %p902_p1 }
  0x45   : > { %s793_s28 = sand.u32 1, %s620_s10   ;;  %p904_p11 = scmp.ne.s32.totalorder %s896_s20, 0 }
  0x46   : > { %605 = vsyncadd (%p903_p2), [#allocation6], 4294967280  ;;  %s425_s3 = sshll.u32 %s793_s28, 6  ;;  %s149_s25 = scalar_lea.sflag [#allocation4], %s793_s28 }
  0x47   : > { %s152_s26 = scalar_lea.vmem [#allocation7], %s425_s3 }
  0x48   : > { %607 = dma.done.wait (%p904_p11), %s149_s25, 1024  }
  0x49   : > { %609 = vsyncadd (%p904_p11), %s149_s25, 4294966272 }
  0x4a   : > { %157 = sfence }
  0x4b   : > { %v174_v0 = vld [vmem:[%s152_s26] sm:$0xff]  ;;  %v175_v1 = vld [vmem:[%s152_s26 + $0x8] sm:$0xff]  ;;  %v427_v2 = vld [vmem:[%s152_s26 + $0x10] sm:$0xff]  ;;  %v634_v7 = vmov 0.0   ;;  %vm194_vm0 = vcmask 130048   ;;  %s433_s20 = sld [smem:[#allocation3 + $0x4]] }
  0x4c   : > { %v428_v3 = vld [vmem:[%s152_s26 + $0x18] sm:$0xff]  ;;  %v179_v4 = vadd.f32 %v427_v2, %v174_v0  ;;  %v429_v5 = vld [vmem:[%s152_s26 + $0x20] sm:$0xff]  ;;  %v430_v6 = vld [vmem:[%s152_s26 + $0x28] sm:$0xff]  ;;  %191 = vst [vmem:[#allocation2] sm:$0xff] %v634_v7  ;;  %s434_s23 = sld [smem:[#allocation3 + $0x5]]  ;;  %s435_s19 = sld [smem:[#allocation3 + $0x6]] }
  0x4d   : > { %192 = vst [vmem:[#allocation2 + $0x8] sm:$0xff] %v634_v7  ;;  %193 = vst [vmem:[#allocation2 + $0x10] sm:$0xff] %v634_v7  ;;  %v180_v8 = vadd.f32 %v428_v3, %v175_v1  ;;  %v431_v9 = vld [vmem:[%s152_s26 + $0x30] sm:$0xff]  ;;  %v432_v11 = vld [vmem:[%s152_s26 + $0x38] sm:$0xff]  ;;  %s436_s29 = sld [smem:[#allocation3 + $0x7]]  ;;  %s437_s30 = sld [smem:[#allocation3 + $0x8]] }
  0x4e   : > { %v184_v10 = vadd.f32 %v429_v5, %v179_v4  ;;  %s635_s4 = smov 127   ;;  %s636_s5 = smov 1  }
  0x4f   : > { %v185_v12 = vadd.f32 %v430_v6, %v180_v8  ;;  %s637_s6 = smov 2   ;;  %s638_s7 = smov 126  }
  0x50   : > { %v189_v13 = vadd.f32 %v431_v9, %v184_v10  ;;  %s639_s24 = smov 3   ;;  %s640_s27 = smov 125  }
  0x51   : > { %v190_v14 = vadd.f32 %v432_v11, %v185_v12  ;;  %v204_v15 = vstv %s433_s20  ;;  %s641_s8 = smov 4   ;;  %s642_s14 = smov 124  }
  0x52   : > { %195 = vst.msk [vmem:[#allocation2 + $0x4] sm:$0xff] %vm194_vm0, %v189_v13  ;;  %v805_v20 = vstv %s434_s23  ;;  %v807_v22 = vstv %s435_s19  ;;  %s444_s16 = sshll.u32 %s682_s13, 10  ;;  %s173_s17 = scalar_lea.vmem [#allocation8], %s425_s3 }
  0x53   : > { %196 = vst.msk [vmem:[#allocation2 + $0xc] sm:$0xff] %vm194_vm0, %v190_v14  ;;  %v809_v28 = vstv %s436_s29  ;;  %v814_v44 = vstv %s437_s30  ;;  %s331_s25 = sshll.u32 %s173_s17, 4  ;;  %s835_s23 = scalar_lea.hbm %s891_s2, %s444_s16  ;;  %s837_s25 = int_to_ptr.vmem [resolvable:$true] %s331_s25 }
  0x54   : > { %s318_s13 = scalar_lea.sflag [#allocation5], %s793_s28  ;;  %s558_s3 = scalar_lea.vmem %s837_s25, 1024 }
  0x55   : > { %p559_p12 = scmp.ne.s32.totalorder %s837_s25, %s558_s3  ;;  %p905_p13 = scmp.ne.s32.totalorder %s897_s21, 0 }
  0x56   : > { %s643_s19 = smov [#allocation8]  }
  0x57   : > { %p560_p7 = pnand %p559_p12, %p905_p13  ;;  %s562_s29 = sshll.u32 %s643_s19, 4  ;;  %s563_s29 = int_to_ptr.vmem [resolvable:$false] %s562_s29 }
  0x58   : > { %s564_s30 = scalar_lea.vmem %s563_s29, 2048  ;;  %p565_p6 = scmp.lt.s32.totalorder %s837_s25, %s563_s29 }
  0x59   : > { %v202_v16 = vld [vmem:[#allocation2 + $0x4] sm:$0xff]  ;;  %p561_p3 = pneg %p560_p7  ;;  %p566_p4 = scmp.lt.s32.totalorder %s564_s30, %s558_s3 }
  0x5a   : > { %v209_v17 = vld [vmem:[#allocation2 + $0x3] sm:$0xff]  ;;  %v205_v24 = vmul.f32 %v204_v15, %v202_v16  ;;  %v203_v33 = vld [vmem:[#allocation2 + $0xc] sm:$0xff] }
  0x5b   : > { %v220_v18 = vld [vmem:[#allocation2 + $0x2] sm:$0xff]  ;;  %v208_v34 = vld [vmem:[#allocation2 + $0xd] sm:$0xff]  ;;  %v206_v38 = vmul.f32 %v204_v15, %v203_v33  ;;  %p567_p5 = por %p566_p4, %p565_p6 }
  0x5c   : > { %v207_v19 = vld [vmem:[#allocation2 + $0x5] sm:$0xff]  ;;  %v219_v40 = vld [vmem:[#allocation2 + $0xe] sm:$0xff] }
  0x5d   : > { %v218_v21 = vld [vmem:[#allocation2 + $0x6] sm:$0xff]  ;;  %v211_v25 = vadd.f32 %v209_v17, %v207_v19  ;;  %v230_v42 = vld [vmem:[#allocation2 + $0xf] sm:$0xff]  ;;  %p568_p0 = pnand %p567_p5, %p561_p3 }
  0x5e   : > { %v229_v23 = vld [vmem:[#allocation2 + $0x7] sm:$0xff]  ;;  %v222_v26 = vadd.f32 %v220_v18, %v218_v21  ;;  %v241_v47 = vld [vmem:[#allocation2 + $0x10] sm:$0xff] }
  0x5f   : > { %v231_v27 = vld [vmem:[#allocation2 + $0x1] sm:$0xff]  ;;  %v210_v35 = vld [vmem:[#allocation2 + $0xb] sm:$0xff]  ;;  %v214_v36 = vmul.f32 %v805_v20, %v211_v25 }
  0x60   : > { %v240_v29 = vld [vmem:[#allocation2 + $0x8] sm:$0xff]  ;;  %v242_v30 = vld [vmem:[#allocation2] sm:$0xff]  ;;  %v233_v31 = vadd.f32 %v231_v27, %v229_v23  ;;  %v225_v37 = vmul.f32 %v807_v22, %v222_v26  ;;  %v212_v39 = vadd.f32 %v210_v35, %v208_v34 }
  0x61   : > { %v244_v32 = vadd.f32 %v242_v30, %v240_v29  ;;  %v221_v41 = vld [vmem:[#allocation2 + $0xa] sm:$0xff]  ;;  %v216_v48 = vadd.f32 %v214_v36, %v205_v24  ;;  %v245_v51 = vadd.f32 %v241_v47, %v240_v29 }
  0x62   : > { %v236_v43 = vmul.f32 %v809_v28, %v233_v31  ;;  %v223_v45 = vadd.f32 %v221_v41, %v219_v40  ;;  %v232_v46 = vld [vmem:[#allocation2 + $0x9] sm:$0xff]  ;;  %v215_v49 = vmul.f32 %v805_v20, %v212_v39 }
  0x63   : > { %v234_v50 = vadd.f32 %v232_v46, %v230_v42  ;;  %v227_v53 = vadd.f32 %v225_v37, %v216_v48  ;;  %v247_v54 = vmul.f32 %v814_v44, %v244_v32  ;;  %v248_v59 = vmul.f32 %v814_v44, %v245_v51 }
  0x64   : > { %v226_v52 = vmul.f32 %v807_v22, %v223_v45  ;;  %v217_v55 = vadd.f32 %v215_v49, %v206_v38 }
  0x65   : > { %v237_v56 = vmul.f32 %v809_v28, %v234_v50  ;;  %v238_v57 = vadd.f32 %v236_v43, %v227_v53 }
  0x66   : > { %v228_v58 = vadd.f32 %v226_v52, %v217_v55 }
  0x67   : > { %v249_v60 = vadd.f32 %v247_v54, %v238_v57 }
  0x68   : > { %v239_v61 = vadd.f32 %v237_v56, %v228_v58 }
  0x69   : > { %257 = vrot.lane.b32.xlu1 %v249_v60, %s635_s4  ;;  %253 = vrot.lane.b32.xlu0 %v249_v60, %s636_s5  ;;  %v251_v63 = vmul.f32 %v249_v60, %v204_v15 }
  0x6a   : > { %v250_v62 = vadd.f32 %v248_v59, %v239_v61 }
  0x6c   : > { %v252_v0 = vmul.f32 %v250_v62, %v204_v15 }
  0x6d   : > { %259 = vrot.lane.b32.xlu1 %v250_v62, %s635_s4  ;;  %255 = vrot.lane.b32.xlu0 %v250_v62, %s636_s5 }
  0x71   : > { %269 = vrot.lane.b32.xlu1 %v250_v62, %s637_s6  ;;  %267 = vrot.lane.b32.xlu0 %v249_v60, %s637_s6 }
  0x75   : > { %273 = vrot.lane.b32.xlu1 %v250_v62, %s638_s7  ;;  %271 = vrot.lane.b32.xlu0 %v249_v60, %s638_s7 }
  0x79   : > { %283 = vrot.lane.b32.xlu1 %v250_v62, %s639_s24  ;;  %281 = vrot.lane.b32.xlu0 %v249_v60, %s639_s24 }
  0x7d   : > { %287 = vrot.lane.b32.xlu1 %v250_v62, %s640_s27  ;;  %285 = vrot.lane.b32.xlu0 %v249_v60, %s640_s27 }
  0x81   : > { %297 = vrot.lane.b32.xlu1 %v250_v62, %s641_s8  ;;  %295 = vrot.lane.b32.xlu0 %v249_v60, %s641_s8 }
  0x85   : > { %301 = vrot.lane.b32.xlu1 %v250_v62, %s642_s14  ;;  %299 = vrot.lane.b32.xlu0 %v249_v60, %s642_s14 }
  0xdb   : > { %v258_v1 = vpop.permute.xlu1 %257  ;;  %v254_v2 = vpop.permute.xlu0 %253 }
  0xdc   : > { %v261_v11 = vadd.f32 %v258_v1, %v254_v2 }
  0xde   : > { %v263_v17 = vmul.f32 %v261_v11, %v805_v20 }
  0xdf   : > { %v260_v3 = vpop.permute.xlu1 %259  ;;  %v256_v4 = vpop.permute.xlu0 %255 }
  0xe0   : > { %v262_v12 = vadd.f32 %v260_v3, %v256_v4  ;;  %v265_v27 = vadd.f32 %v263_v17, %v251_v63 }
  0xe2   : > { %v264_v18 = vmul.f32 %v262_v12, %v805_v20 }
  0xe3   : > { %v270_v5 = vpop.permute.xlu1 %269  ;;  %v268_v6 = vpop.permute.xlu0 %267 }
  0xe4   : > { %v266_v29 = vadd.f32 %v264_v18, %v252_v0 }
  0xe7   : > { %v274_v7 = vpop.permute.xlu1 %273  ;;  %v272_v8 = vpop.permute.xlu0 %271 }
  0xe8   : > { %v276_v15 = vadd.f32 %v274_v7, %v270_v5  ;;  %v275_v16 = vadd.f32 %v272_v8, %v268_v6 }
  0xea   : > { %v278_v25 = vmul.f32 %v276_v15, %v807_v22  ;;  %v277_v26 = vmul.f32 %v275_v16, %v807_v22 }
  0xeb   : > { %v284_v9 = vpop.permute.xlu1 %283  ;;  %v282_v10 = vpop.permute.xlu0 %281 }
  0xec   : > { %v280_v34 = vadd.f32 %v278_v25, %v266_v29  ;;  %v279_v20 = vadd.f32 %v277_v26, %v265_v27 }
  0xef   : > { %v288_v13 = vpop.permute.xlu1 %287  ;;  %v286_v14 = vpop.permute.xlu0 %285 }
  0xf0   : > { %v290_v19 = vadd.f32 %v288_v13, %v284_v9  ;;  %v289_v21 = vadd.f32 %v286_v14, %v282_v10 }
  0xf2   : > { %v292_v30 = vmul.f32 %v290_v19, %v809_v28  ;;  %v291_v31 = vmul.f32 %v289_v21, %v809_v28 }
  0xf3   : > { %v298_v23 = vpop.permute.xlu1 %297  ;;  %v296_v24 = vpop.permute.xlu0 %295 }
  0xf4   : > { %v294_v37 = vadd.f32 %v292_v30, %v280_v34  ;;  %v293_v38 = vadd.f32 %v291_v31, %v279_v20 }
  0xf7   : > { %v302_v32 = vpop.permute.xlu1 %301  ;;  %v300_v33 = vpop.permute.xlu0 %299 }
  0xf8   : > { %v304_v35 = vadd.f32 %v302_v32, %v298_v23  ;;  %v303_v36 = vadd.f32 %v300_v33, %v296_v24 }
  0xfa   : > { %v306_v22 = vmul.f32 %v304_v35, %v814_v44  ;;  %v305_v39 = vmul.f32 %v303_v36, %v814_v44 }
  0xfc   : > { %v308_v28 = vadd.f32 %v306_v22, %v294_v37  ;;  %v307_v40 = vadd.f32 %v305_v39, %v293_v38 }
  0xfe   : > { %310 = vst.msk [vmem:[%s173_s17 + $0x8] sm:$0xff] %vm194_vm0, %v308_v28  ;;  %312 = vst.msk [vmem:[%s173_s17 + $0x18] sm:$0xff] %vm194_vm0, %v308_v28 }
  0xff   : > { %314 = vst.msk [vmem:[%s173_s17 + $0x28] sm:$0xff] %vm194_vm0, %v308_v28  ;;  %316 = vst.msk [vmem:[%s173_s17 + $0x38] sm:$0xff] %vm194_vm0, %v308_v28 }
 0x100   : > { %309 = vst.msk [vmem:[%s173_s17] sm:$0xff] %vm194_vm0, %v307_v40  ;;  %311 = vst.msk [vmem:[%s173_s17 + $0x10] sm:$0xff] %vm194_vm0, %v307_v40 }
 0x101   : > { %313 = vst.msk [vmem:[%s173_s17 + $0x20] sm:$0xff] %vm194_vm0, %v307_v40  ;;  %315 = vst.msk [vmem:[%s173_s17 + $0x30] sm:$0xff] %vm194_vm0, %v307_v40 }
 0x102   : > { %571 = shalt.err (!%p568_p0)
}
 0x103   : > { %s572_s4 = scalar_lea.hbm %s835_s23, 1024  ;;  %s576_s7 = scalar_lea.hbm %s891_s2, 2048 }
 0x104   : > { %p573_p8 = scmp.ne.s32.totalorder %s835_s23, %s572_s4  ;;  %p577_p1 = scmp.lt.u32.totalorder %s835_s23, %s891_s2 }
 0x105   : > { %p578_p2 = scmp.lt.u32.totalorder %s576_s7, %s572_s4  ;;  %p580_p12 = scmp.lt.u32.totalorder %s572_s4, %s835_s23 }
 0x106   : > { %p574_p9 = pnand %p573_p8, %p905_p13 }
 0x107   : > { %p579_p11 = por %p578_p2, %p577_p1 }
 0x108   : > { %p575_p10 = pneg %p574_p9 }
 0x109   : > { %p581_p7 = por %p580_p12, %p579_p11 }
 0x10b   : > { %p582_p3 = pnand %p581_p7, %p575_p10 }
 0x10d   : > { %585 = shalt.err (!%p582_p3)
}
 0x10e   : > { %s644_s8 = smov 128   ;;  %s645_s14 = smov 8  }
 0x10f   : > { %451 = dma.vmem_to_hbm [thread:$0]  (%p905_p13), %s837_s25, 1024, %s835_s23, %s318_s13, %s644_s8, %s644_s8, %s645_s14  }
 0x110 PF: > { %s346_s16 = sand.u32 1, %s616_s9   ;;  %p906_p6 = scmp.ne.s32.totalorder %s898_s22, 0 }
 0x111   : > { %p907_p4 = scmp.ge.s32.totalorder %s628_s12, 2  ;;  %s347_s17 = scalar_lea.sflag [#allocation5], %s346_s16 }
 0x113   : > { %p462_p5 = pnand %p907_p4, %p906_p6 }
 0x115   : > { %611 = dma.done.wait (!%p462_p5), %s347_s17, 1024  }
 0x116   : > { %613 = vsyncadd (!%p462_p5), %s347_s17, 4294966272  ;;  %p16_p0 = scmp.ge.s32.totalorder %s686_s15, 4   ;;  %s908_s9 = smov %s620_s10 }
 0x117   : > { %s909_s10 = smov %s624_s11  ;;  %s910_s11 = smov %s698_s18 }
 0x118   : > { %s911_s12 = smov %s686_s15  ;;  %18 = sbr.rel (!%p16_p0) target bundleno = 6 (0x6), region = 81 }
 0x11f   :  { %352 = vsyncpa [#allocation4], 1 }
 0x120   :  { %354 = vsyncpa [#allocation4 + $0x1], 1 }
 0x121   :  { %355 = vsyncpa [#allocation5], 1 }
 0x122   :  { %357 = vsyncpa [#allocation5 + $0x1], 1 }
 0x123   :  { %358 = vsyncpa [#allocation6], 1 }
 0x124   :  { %360 = vsyncpa [#allocation6 + $0x1], 1 }

</bundles_post_ra>
